<compile_context>
chip_gen: v7x
topology: tpu7x:2x2x1
jax: 0.10.0
libtpu: 0.0.40
codegen_flags: <defaults>
</compile_context>

<pallas_src>
import functools

import jax
import jax.numpy as jnp
import numpy as np
from jax.experimental import pallas as pl
from jax.experimental.pallas import tpu as pltpu

EPS = 1e-5  # OPT LayerNorm eps


def _layernorm(x, g, b):
    mean = jnp.mean(x, axis=-1, keepdims=True)
    var = jnp.mean((x - mean) ** 2, axis=-1, keepdims=True)
    return (x - mean) * jax.lax.rsqrt(var + EPS) * g + b


def opt_decoder_layer_kernel(
    x_ref,
    g1_ref, b1_ref,
    wqkv_ref, bqkv_ref,
    wo_ref, bo_ref,
    g2_ref, b2_ref,
    w1_ref, b1f_ref, w2_ref, b2f_ref,
    out_ref,
    res2_ref, h2_ref, ctx_ref, acc_ref,
    *, num_heads, head_dim,
):
    f = pl.program_id(1)
    last_f = pl.num_programs(1) - 1
    E = num_heads * head_dim

    # ---- attention block: run once per batch row (first F-tile step) ----
    @pl.when(f == 0)
    def _attention_block():
        x = x_ref[0]                      # (S, E) f32
        S = x.shape[0]

        # pre-LN (f32 elementwise math)
        h = _layernorm(x, g1_ref[0], b1_ref[0])
        h_bf = h.astype(jnp.bfloat16)

        # fused Q/K/V projection: one (S,E)@(E,3E) bf16 matmul, f32 accumulate
        qkv = jnp.dot(h_bf, wqkv_ref[...], preferred_element_type=jnp.float32)
        qkv = qkv + bqkv_ref[0]
        scaling = head_dim ** -0.5
        q = (qkv[:, 0:E] * scaling).astype(jnp.bfloat16)
        k = qkv[:, E:2 * E].astype(jnp.bfloat16)
        v = qkv[:, 2 * E:3 * E].astype(jnp.bfloat16)

        # causal additive mask generated on the VPU (no HBM mask traffic)
        rows = jax.lax.broadcasted_iota(jnp.int32, (S, S), 0)
        cols = jax.lax.broadcasted_iota(jnp.int32, (S, S), 1)
        neg_min = jnp.finfo(jnp.float32).min
        add_mask = jnp.where(rows >= cols, 0.0, neg_min).astype(jnp.float32)

        # static head loop; per-head context written into a lane-packed
        # (S, E) bf16 scratch so the out-projection is one big MXU matmul
        for hidx in range(num_heads):
            sl = slice(hidx * head_dim, (hidx + 1) * head_dim)
            q_h, k_h, v_h = q[:, sl], k[:, sl], v[:, sl]
            # q @ k^T without materializing k^T (contract last dims)
            scores = jax.lax.dot_general(
                q_h, k_h, (((1,), (1,)), ((), ())),
                preferred_element_type=jnp.float32)
            scores = jnp.maximum(scores + add_mask, neg_min)  # HF OPT clamp
            scores = scores - jnp.max(scores, axis=-1, keepdims=True)
            p = jnp.exp(scores)
            p = p * pl.reciprocal(jnp.sum(p, axis=-1, keepdims=True),
                                  approx=True)
            ctx_h = jnp.dot(p.astype(jnp.bfloat16), v_h,
                            preferred_element_type=jnp.float32)
            ctx_ref[:, sl] = ctx_h.astype(jnp.bfloat16)

        # single out-projection matmul over all heads
        attn_out = jnp.dot(ctx_ref[...], wo_ref[...],
                           preferred_element_type=jnp.float32)

        h_attn = x + attn_out + bo_ref[0]          # residual add (f32)
        res2_ref[...] = h_attn
        h2_ref[...] = _layernorm(h_attn, g2_ref[0], b2_ref[0]).astype(jnp.bfloat16)
        acc_ref[...] = jnp.zeros_like(acc_ref)

    # ---- feed-forward block, streamed over F tiles (reduction grid axis) ----
    a = jnp.dot(h2_ref[...], w1_ref[...], preferred_element_type=jnp.float32)
    a = jnp.maximum(a + b1f_ref[0], 0.0)           # OPT activation_fn = ReLU
    acc_ref[...] += jnp.dot(a.astype(jnp.bfloat16), w2_ref[...],
                            preferred_element_type=jnp.float32)

    # only the last F step does the final residual add + output store
    @pl.when(f == last_f)
    def _finalize():
        out_ref[0] = res2_ref[...] + acc_ref[...] + b2f_ref[0]


def opt_decoder_layer(hidden_states, params, *, num_heads, f_tile=128):
    B, S, E = hidden_states.shape
    F = params["fc1_w"].shape[1]
    head_dim = E // num_heads
    assert E % num_heads == 0 and F % f_tile == 0
    nf = F // f_tile

    # one-time layout plumbing: pack QKV, bf16 weights
    wqkv = jnp.concatenate(
        [params["wq"], params["wk"], params["wv"]], axis=1).astype(jnp.bfloat16)
    bqkv = jnp.concatenate([params["bq"], params["bk"], params["bv"]], axis=1)
    wo = params["wo"].astype(jnp.bfloat16)
    fc1_w = params["fc1_w"].astype(jnp.bfloat16)
    fc2_w = params["fc2_w"].astype(jnp.bfloat16)

    def const(shape):
        nd = len(shape)
        return pl.BlockSpec(shape, lambda b, f, _nd=nd: (0,) * _nd)

    in_specs = [
        pl.BlockSpec((1, S, E), lambda b, f: (b, 0, 0)),      # hidden_states
        const((1, E)), const((1, E)),                         # ln1 gamma/beta
        const((E, 3 * E)), const((1, 3 * E)),                 # packed qkv w/b
        const((E, E)), const((1, E)),                         # out proj w/b
        const((1, E)), const((1, E)),                         # ln2 gamma/beta
        pl.BlockSpec((E, f_tile), lambda b, f: (0, f)),       # fc1 weight tile
        pl.BlockSpec((1, f_tile), lambda b, f: (0, f)),       # fc1 bias tile
        pl.BlockSpec((f_tile, E), lambda b, f: (f, 0)),       # fc2 weight tile
        const((1, E)),                                        # fc2 bias
    ]

    flops = B * (2 * S * E * 3 * E       # qkv projection
                 + 4 * S * S * E         # scores + context
                 + 2 * S * E * E         # out projection
                 + 4 * S * E * F)        # fc1 + fc2
    transcendentals = B * (num_heads * S * S + 2 * S)
    bytes_accessed = (2 * B * S * E * 4                      # x in + out (f32)
                      + (3 * E * E + E * E + 2 * E * F) * 2  # bf16 weights
                      + (3 * E + E + F + E + 4 * E) * 4)     # f32 biases/LN

    kernel = functools.partial(
        opt_decoder_layer_kernel, num_heads=num_heads, head_dim=head_dim)

    return pl.pallas_call(
        kernel,
        out_shape=jax.ShapeDtypeStruct((B, S, E), jnp.float32),
        grid=(B, nf),
        in_specs=in_specs,
        out_specs=pl.BlockSpec((1, S, E), lambda b, f: (b, 0, 0)),
        scratch_shapes=[
            pltpu.VMEM((S, E), jnp.float32),   # residual after attention
            pltpu.VMEM((S, E), jnp.bfloat16),  # LN2 output (MXU input)
            pltpu.VMEM((S, E), jnp.bfloat16),  # packed per-head attn context
            pltpu.VMEM((S, E), jnp.float32),   # FFN accumulator
        ],
        compiler_params=pltpu.CompilerParams(
            dimension_semantics=("parallel", "arbitrary"),
            vmem_limit_bytes=48 * 1024 * 1024,
        ),
        cost_estimate=pl.CostEstimate(
            flops=flops, transcendentals=transcendentals,
            bytes_accessed=bytes_accessed),
    )(
        hidden_states,
        params["ln1_g"], params["ln1_b"],
        wqkv, bqkv, wo, params["bo"],
        params["ln2_g"], params["ln2_b"],
        fc1_w, params["fc1_b"], fc2_w, params["fc2_b"],
    )


def _reference(x, p, num_heads):
    """Pure-JAX f32 reference matching the PyTorch module (eval, causal mask)."""
    B, S, E = x.shape
    D = E // num_heads
    neg = jnp.finfo(jnp.float32).min
    causal = jnp.where(
        jnp.arange(S)[:, None] >= jnp.arange(S)[None, :], 0.0, neg
    ).astype(jnp.float32)
    outs = []
    for b in range(B):
        h0 = x[b]
        res = h0
        h = _layernorm(h0, p["ln1_g"][0], p["ln1_b"][0])
        q = (h @ p["wq"] + p["bq"][0]) * (D ** -0.5)
        k = h @ p["wk"] + p["bk"][0]
        v = h @ p["wv"] + p["bv"][0]
        ctxs = []
        for hd in range(num_heads):
            sl = slice(hd * D, (hd + 1) * D)
            s = jnp.maximum(q[:, sl] @ k[:, sl].T + causal, neg)
            w = jax.nn.softmax(s, axis=-1)
            ctxs.append(w @ v[:, sl])
        ctx = jnp.concatenate(ctxs, axis=-1)
        h = res + (ctx @ p["wo"] + p["bo"][0])
        res2 = h
        h2 = _layernorm(h, p["ln2_g"][0], p["ln2_b"][0])
        a = jnp.maximum(h2 @ p["fc1_w"] + p["fc1_b"][0], 0.0)
        outs.append(res2 + (a @ p["fc2_w"] + p["fc2_b"][0]))
    return jnp.stack(outs)


if __name__ == "__main__":
    B, S, E, H, F = 2, 8, 32, 4, 256

    key = jax.random.PRNGKey(0)
    keys = jax.random.split(key, 16)
    hidden_states = jax.random.normal(keys[0], (B, S, E), dtype=jnp.float32)

    def w(k, shape, scale=0.02):
        return (scale * jax.random.normal(k, shape)).astype(jnp.float32)

    params = {
        "ln1_g": (1.0 + w(keys[7], (1, E))),
        "ln1_b": w(keys[8], (1, E)),
        # weights stored as (in, out) so the kernel does x @ W + b
        "wq": w(keys[1], (E, E)), "bq": w(keys[9], (1, E)),
        "wk": w(keys[2], (E, E)), "bk": w(keys[10], (1, E)),
        "wv": w(keys[3], (E, E)), "bv": w(keys[11], (1, E)),
        "wo": w(keys[4], (E, E)), "bo": w(keys[12], (1, E)),
        "ln2_g": (1.0 + w(keys[13], (1, E))),
        "ln2_b": w(keys[14], (1, E)),
        "fc1_w": w(keys[5], (E, F)), "fc1_b": w(keys[15], (1, F)),
        "fc2_w": w(keys[6], (F, E)), "fc2_b": jnp.zeros((1, E), jnp.float32),
    }

    out = opt_decoder_layer(hidden_states, params, num_heads=H, f_tile=128)
    out = jax.block_until_ready(out)

    ref = _reference(hidden_states, params, H)
    # bf16 MXU inputs + approx reciprocal -> relax tolerance vs. pure-f32 ref
    np.testing.assert_allclose(np.asarray(out), np.asarray(ref),
                               rtol=2e-2, atol=2e-2)

    print("KERNEL_OK")
</pallas_src>

<mosaic_0001>
module attributes {stable_mosaic.version = 11 : i64} {
  func.func @opt_decoder_layer_kernel(%arg0: i32, %arg1: i32, %arg2: memref<1x8x32xf32, #tpu.memory_space<vmem>>, %arg3: memref<1x32xf32, #tpu.memory_space<vmem>>, %arg4: memref<1x32xf32, #tpu.memory_space<vmem>>, %arg5: memref<32x96xbf16, #tpu.memory_space<vmem>>, %arg6: memref<1x96xf32, #tpu.memory_space<vmem>>, %arg7: memref<32x32xbf16, #tpu.memory_space<vmem>>, %arg8: memref<1x32xf32, #tpu.memory_space<vmem>>, %arg9: memref<1x32xf32, #tpu.memory_space<vmem>>, %arg10: memref<1x32xf32, #tpu.memory_space<vmem>>, %arg11: memref<32x128xbf16, #tpu.memory_space<vmem>>, %arg12: memref<1x128xf32, #tpu.memory_space<vmem>>, %arg13: memref<128x32xbf16, #tpu.memory_space<vmem>>, %arg14: memref<1x32xf32, #tpu.memory_space<vmem>>, %arg15: memref<1x8x32xf32, #tpu.memory_space<vmem>>, %arg16: memref<8x32xf32, #tpu.memory_space<vmem>>, %arg17: memref<8x32xbf16, #tpu.memory_space<vmem>>, %arg18: memref<8x32xbf16, #tpu.memory_space<vmem>>, %arg19: memref<8x32xf32, #tpu.memory_space<vmem>>) attributes {dimension_semantics = [#tpu.dimension_semantics<parallel>, #tpu.dimension_semantics<arbitrary>], iteration_bounds = array<i64: 2, 2>, scalar_prefetch = 0 : i64, scratch_operands = 4 : i64, tpu.core_type = #tpu.core_type<tc>, window_params = [{transform_indices = @transform_0, window_bounds = array<i64: 1, 8, 32>}, {pipeline_mode = #tpu.pipeline_mode<synchronous>, transform_indices = @transform_1, window_bounds = array<i64: 1, 32>}, {pipeline_mode = #tpu.pipeline_mode<synchronous>, transform_indices = @transform_2, window_bounds = array<i64: 1, 32>}, {pipeline_mode = #tpu.pipeline_mode<synchronous>, transform_indices = @transform_3, window_bounds = array<i64: 32, 96>}, {pipeline_mode = #tpu.pipeline_mode<synchronous>, transform_indices = @transform_4, window_bounds = array<i64: 1, 96>}, {pipeline_mode = #tpu.pipeline_mode<synchronous>, transform_indices = @transform_5, window_bounds = array<i64: 32, 32>}, {pipeline_mode = #tpu.pipeline_mode<synchronous>, transform_indices = @transform_6, window_bounds = array<i64: 1, 32>}, {pipeline_mode = #tpu.pipeline_mode<synchronous>, transform_indices = @transform_7, window_bounds = array<i64: 1, 32>}, {pipeline_mode = #tpu.pipeline_mode<synchronous>, transform_indices = @transform_8, window_bounds = array<i64: 1, 32>}, {transform_indices = @transform_9, window_bounds = array<i64: 32, 128>}, {transform_indices = @transform_10, window_bounds = array<i64: 1, 128>}, {transform_indices = @transform_11, window_bounds = array<i64: 128, 32>}, {pipeline_mode = #tpu.pipeline_mode<synchronous>, transform_indices = @transform_12, window_bounds = array<i64: 1, 32>}, {transform_indices = @transform_13, window_bounds = array<i64: 1, 8, 32>}]} {
    %c0_i32 = arith.constant 0 : i32
    %0 = arith.cmpi eq, %arg1, %c0_i32 : i32
    %1 = arith.extui %0 : i1 to i32
    %c0_i32_0 = arith.constant 0 : i32
    %2 = arith.cmpi ne, %1, %c0_i32_0 : i32
    scf.if %2 {
      %c0_15 = arith.constant 0 : index
      %c0_16 = arith.constant 0 : index
      %c0_17 = arith.constant 0 : index
      %22 = vector.load %arg2[%c0_15, %c0_16, %c0_17] : memref<1x8x32xf32, #tpu.memory_space<vmem>>, vector<1x8x32xf32>
      %23 = vector.shape_cast %22 : vector<1x8x32xf32> to vector<8x32xf32>
      %c0_18 = arith.constant 0 : index
      %c0_19 = arith.constant 0 : index
      %24 = vector.load %arg3[%c0_18, %c0_19] : memref<1x32xf32, #tpu.memory_space<vmem>>, vector<1x32xf32>
      %25 = vector.shape_cast %24 : vector<1x32xf32> to vector<32xf32>
      %c0_20 = arith.constant 0 : index
      %c0_21 = arith.constant 0 : index
      %26 = vector.load %arg4[%c0_20, %c0_21] : memref<1x32xf32, #tpu.memory_space<vmem>>, vector<1x32xf32>
      %27 = vector.shape_cast %26 : vector<1x32xf32> to vector<32xf32>
      %cst_22 = arith.constant dense<0.000000e+00> : vector<8xf32>
      %28 = vector.multi_reduction <add>, %23, %cst_22 [1] : vector<8x32xf32> to vector<8xf32>
      %29 = vector.shape_cast %28 : vector<8xf32> to vector<8x1xf32>
      %cst_23 = arith.constant 3.200000e+01 : f32
      %30 = vector.broadcast %cst_23 : f32 to vector<8x1xf32>
      %31 = arith.divf %29, %30 : vector<8x1xf32>
      %32 = vector.broadcast %31 : vector<8x1xf32> to vector<8x32xf32>
      %33 = arith.subf %23, %32 : vector<8x32xf32>
      %34 = arith.mulf %33, %33 : vector<8x32xf32>
      %cst_24 = arith.constant dense<0.000000e+00> : vector<8xf32>
      %35 = vector.multi_reduction <add>, %34, %cst_24 [1] : vector<8x32xf32> to vector<8xf32>
      %36 = vector.shape_cast %35 : vector<8xf32> to vector<8x1xf32>
      %cst_25 = arith.constant 3.200000e+01 : f32
      %37 = vector.broadcast %cst_25 : f32 to vector<8x1xf32>
      %38 = arith.divf %36, %37 : vector<8x1xf32>
      %39 = vector.broadcast %31 : vector<8x1xf32> to vector<8x32xf32>
      %40 = arith.subf %23, %39 : vector<8x32xf32>
      %cst_26 = arith.constant 9.99999974E-6 : f32
      %41 = vector.broadcast %cst_26 : f32 to vector<8x1xf32>
      %42 = arith.addf %38, %41 : vector<8x1xf32>
      %43 = math.rsqrt %42 : vector<8x1xf32>
      %44 = vector.broadcast %43 : vector<8x1xf32> to vector<8x32xf32>
      %45 = arith.mulf %40, %44 : vector<8x32xf32>
      %46 = vector.shape_cast %25 : vector<32xf32> to vector<1x32xf32>
      %47 = vector.broadcast %46 : vector<1x32xf32> to vector<8x32xf32>
      %48 = arith.mulf %45, %47 : vector<8x32xf32>
      %49 = vector.shape_cast %27 : vector<32xf32> to vector<1x32xf32>
      %50 = vector.broadcast %49 : vector<1x32xf32> to vector<8x32xf32>
      %51 = arith.addf %48, %50 : vector<8x32xf32>
      %52 = arith.truncf %51 : vector<8x32xf32> to vector<8x32xbf16>
      %c0_27 = arith.constant 0 : index
      %c0_28 = arith.constant 0 : index
      %53 = vector.load %arg5[%c0_27, %c0_28] : memref<32x96xbf16, #tpu.memory_space<vmem>>, vector<32x96xbf16>
      %cst_29 = arith.constant dense<0.000000e+00> : vector<8x96xf32>
      %54 = tpu.matmul %52, %53, %cst_29 {dimension_numbers = #tpu.dot_dimension_numbers<[1], [0], [0], [1], [0, 0, 1, 1], [], []>} : vector<8x32xbf16>, vector<32x96xbf16>, vector<8x96xf32> -> vector<8x96xf32>
      %c0_30 = arith.constant 0 : index
      %c0_31 = arith.constant 0 : index
      %55 = vector.load %arg6[%c0_30, %c0_31] : memref<1x96xf32, #tpu.memory_space<vmem>>, vector<1x96xf32>
      %56 = vector.shape_cast %55 : vector<1x96xf32> to vector<96xf32>
      %57 = vector.shape_cast %56 : vector<96xf32> to vector<1x96xf32>
      %58 = vector.broadcast %57 : vector<1x96xf32> to vector<8x96xf32>
      %59 = arith.addf %54, %58 : vector<8x96xf32>
      %60 = vector.extract_strided_slice %59 {offsets = [0, 0], sizes = [8, 32], strides = [1, 1]} : vector<8x96xf32> to vector<8x32xf32>
      %cst_32 = arith.constant 0.353553385 : f32
      %61 = vector.broadcast %cst_32 : f32 to vector<8x32xf32>
      %62 = arith.mulf %60, %61 : vector<8x32xf32>
      %63 = arith.truncf %62 : vector<8x32xf32> to vector<8x32xbf16>
      %64 = vector.extract_strided_slice %59 {offsets = [0, 32], sizes = [8, 32], strides = [1, 1]} : vector<8x96xf32> to vector<8x32xf32>
      %65 = arith.truncf %64 : vector<8x32xf32> to vector<8x32xbf16>
      %66 = vector.extract_strided_slice %59 {offsets = [0, 64], sizes = [8, 32], strides = [1, 1]} : vector<8x96xf32> to vector<8x32xf32>
      %67 = arith.truncf %66 : vector<8x32xf32> to vector<8x32xbf16>
      %68 = tpu.iota {dimensions = array<i32: 0>} : vector<8x8xi32>
      %69 = tpu.iota {dimensions = array<i32: 1>} : vector<8x8xi32>
      %70 = arith.cmpi sge, %68, %69 : vector<8x8xi32>
      %cst_33 = arith.constant 0.000000e+00 : f32
      %cst_34 = arith.constant -3.40282347E+38 : f32
      %71 = vector.broadcast %cst_33 : f32 to vector<8x8xf32>
      %72 = vector.broadcast %cst_34 : f32 to vector<8x8xf32>
      %73 = arith.select %70, %71, %72 : vector<8x8xi1>, vector<8x8xf32>
      %74 = vector.extract_strided_slice %63 {offsets = [0, 0], sizes = [8, 8], strides = [1, 1]} : vector<8x32xbf16> to vector<8x8xbf16>
      %75 = vector.extract_strided_slice %65 {offsets = [0, 0], sizes = [8, 8], strides = [1, 1]} : vector<8x32xbf16> to vector<8x8xbf16>
      %76 = vector.extract_strided_slice %67 {offsets = [0, 0], sizes = [8, 8], strides = [1, 1]} : vector<8x32xbf16> to vector<8x8xbf16>
      %cst_35 = arith.constant dense<0.000000e+00> : vector<8x8xf32>
      %77 = tpu.matmul %74, %75, %cst_35 {dimension_numbers = #tpu.dot_dimension_numbers<[1], [1], [0], [0], [0, 0, 1, 0], [], []>} : vector<8x8xbf16>, vector<8x8xbf16>, vector<8x8xf32> -> vector<8x8xf32>
      %78 = arith.addf %77, %73 : vector<8x8xf32>
      %cst_36 = arith.constant -3.40282347E+38 : f32
      %79 = vector.broadcast %cst_36 : f32 to vector<8x8xf32>
      %80 = arith.maximumf %78, %79 : vector<8x8xf32>
      %cst_37 = arith.constant dense<0xFF800000> : vector<8xf32>
      %81 = vector.multi_reduction <maximumf>, %80, %cst_37 [1] : vector<8x8xf32> to vector<8xf32>
      %82 = vector.shape_cast %81 : vector<8xf32> to vector<8x1xf32>
      %83 = vector.broadcast %82 : vector<8x1xf32> to vector<8x8xf32>
      %84 = arith.subf %80, %83 : vector<8x8xf32>
      %85 = math.exp %84 : vector<8x8xf32>
      %cst_38 = arith.constant dense<0.000000e+00> : vector<8xf32>
      %86 = vector.multi_reduction <add>, %85, %cst_38 [1] : vector<8x8xf32> to vector<8xf32>
      %87 = vector.shape_cast %86 : vector<8xf32> to vector<8x1xf32>
      %88 = tpu.reciprocal %87 {approx = true} : vector<8x1xf32> -> vector<8x1xf32>
      %89 = vector.broadcast %88 : vector<8x1xf32> to vector<8x8xf32>
      %90 = arith.mulf %85, %89 : vector<8x8xf32>
      %91 = arith.truncf %90 : vector<8x8xf32> to vector<8x8xbf16>
      %cst_39 = arith.constant dense<0.000000e+00> : vector<8x8xf32>
      %92 = tpu.matmul %91, %76, %cst_39 {dimension_numbers = #tpu.dot_dimension_numbers<[1], [0], [0], [1], [0, 0, 1, 1], [], []>} : vector<8x8xbf16>, vector<8x8xbf16>, vector<8x8xf32> -> vector<8x8xf32>
      %93 = arith.truncf %92 : vector<8x8xf32> to vector<8x8xbf16>
      %c0_40 = arith.constant 0 : index
      %c0_41 = arith.constant 0 : index
      %94 = vector.load %arg18[%c0_40, %c0_41] : memref<8x32xbf16, #tpu.memory_space<vmem>>, vector<8x8xbf16>
      tpu.vector_store %arg18[%c0_40, %c0_41], %93 {strides = array<i32>} : memref<8x32xbf16, #tpu.memory_space<vmem>>, vector<8x8xbf16>,
      %95 = vector.extract_strided_slice %63 {offsets = [0, 8], sizes = [8, 8], strides = [1, 1]} : vector<8x32xbf16> to vector<8x8xbf16>
      %96 = vector.extract_strided_slice %65 {offsets = [0, 8], sizes = [8, 8], strides = [1, 1]} : vector<8x32xbf16> to vector<8x8xbf16>
      %97 = vector.extract_strided_slice %67 {offsets = [0, 8], sizes = [8, 8], strides = [1, 1]} : vector<8x32xbf16> to vector<8x8xbf16>
      %cst_42 = arith.constant dense<0.000000e+00> : vector<8x8xf32>
      %98 = tpu.matmul %95, %96, %cst_42 {dimension_numbers = #tpu.dot_dimension_numbers<[1], [1], [0], [0], [0, 0, 1, 0], [], []>} : vector<8x8xbf16>, vector<8x8xbf16>, vector<8x8xf32> -> vector<8x8xf32>
      %99 = arith.addf %98, %73 : vector<8x8xf32>
      %cst_43 = arith.constant -3.40282347E+38 : f32
      %100 = vector.broadcast %cst_43 : f32 to vector<8x8xf32>
      %101 = arith.maximumf %99, %100 : vector<8x8xf32>
      %cst_44 = arith.constant dense<0xFF800000> : vector<8xf32>
      %102 = vector.multi_reduction <maximumf>, %101, %cst_44 [1] : vector<8x8xf32> to vector<8xf32>
      %103 = vector.shape_cast %102 : vector<8xf32> to vector<8x1xf32>
      %104 = vector.broadcast %103 : vector<8x1xf32> to vector<8x8xf32>
      %105 = arith.subf %101, %104 : vector<8x8xf32>
      %106 = math.exp %105 : vector<8x8xf32>
      %cst_45 = arith.constant dense<0.000000e+00> : vector<8xf32>
      %107 = vector.multi_reduction <add>, %106, %cst_45 [1] : vector<8x8xf32> to vector<8xf32>
      %108 = vector.shape_cast %107 : vector<8xf32> to vector<8x1xf32>
      %109 = tpu.reciprocal %108 {approx = true} : vector<8x1xf32> -> vector<8x1xf32>
      %110 = vector.broadcast %109 : vector<8x1xf32> to vector<8x8xf32>
      %111 = arith.mulf %106, %110 : vector<8x8xf32>
      %112 = arith.truncf %111 : vector<8x8xf32> to vector<8x8xbf16>
      %cst_46 = arith.constant dense<0.000000e+00> : vector<8x8xf32>
      %113 = tpu.matmul %112, %97, %cst_46 {dimension_numbers = #tpu.dot_dimension_numbers<[1], [0], [0], [1], [0, 0, 1, 1], [], []>} : vector<8x8xbf16>, vector<8x8xbf16>, vector<8x8xf32> -> vector<8x8xf32>
      %114 = arith.truncf %113 : vector<8x8xf32> to vector<8x8xbf16>
      %c0_47 = arith.constant 0 : index
      %c8 = arith.constant 8 : index
      %115 = vector.load %arg18[%c0_47, %c8] : memref<8x32xbf16, #tpu.memory_space<vmem>>, vector<8x8xbf16>
      tpu.vector_store %arg18[%c0_47, %c8], %114 {strides = array<i32>} : memref<8x32xbf16, #tpu.memory_space<vmem>>, vector<8x8xbf16>,
      %116 = vector.extract_strided_slice %63 {offsets = [0, 16], sizes = [8, 8], strides = [1, 1]} : vector<8x32xbf16> to vector<8x8xbf16>
      %117 = vector.extract_strided_slice %65 {offsets = [0, 16], sizes = [8, 8], strides = [1, 1]} : vector<8x32xbf16> to vector<8x8xbf16>
      %118 = vector.extract_strided_slice %67 {offsets = [0, 16], sizes = [8, 8], strides = [1, 1]} : vector<8x32xbf16> to vector<8x8xbf16>
      %cst_48 = arith.constant dense<0.000000e+00> : vector<8x8xf32>
      %119 = tpu.matmul %116, %117, %cst_48 {dimension_numbers = #tpu.dot_dimension_numbers<[1], [1], [0], [0], [0, 0, 1, 0], [], []>} : vector<8x8xbf16>, vector<8x8xbf16>, vector<8x8xf32> -> vector<8x8xf32>
      %120 = arith.addf %119, %73 : vector<8x8xf32>
      %cst_49 = arith.constant -3.40282347E+38 : f32
      %121 = vector.broadcast %cst_49 : f32 to vector<8x8xf32>
      %122 = arith.maximumf %120, %121 : vector<8x8xf32>
      %cst_50 = arith.constant dense<0xFF800000> : vector<8xf32>
      %123 = vector.multi_reduction <maximumf>, %122, %cst_50 [1] : vector<8x8xf32> to vector<8xf32>
      %124 = vector.shape_cast %123 : vector<8xf32> to vector<8x1xf32>
      %125 = vector.broadcast %124 : vector<8x1xf32> to vector<8x8xf32>
      %126 = arith.subf %122, %125 : vector<8x8xf32>
      %127 = math.exp %126 : vector<8x8xf32>
      %cst_51 = arith.constant dense<0.000000e+00> : vector<8xf32>
      %128 = vector.multi_reduction <add>, %127, %cst_51 [1] : vector<8x8xf32> to vector<8xf32>
      %129 = vector.shape_cast %128 : vector<8xf32> to vector<8x1xf32>
      %130 = tpu.reciprocal %129 {approx = true} : vector<8x1xf32> -> vector<8x1xf32>
      %131 = vector.broadcast %130 : vector<8x1xf32> to vector<8x8xf32>
      %132 = arith.mulf %127, %131 : vector<8x8xf32>
      %133 = arith.truncf %132 : vector<8x8xf32> to vector<8x8xbf16>
      %cst_52 = arith.constant dense<0.000000e+00> : vector<8x8xf32>
      %134 = tpu.matmul %133, %118, %cst_52 {dimension_numbers = #tpu.dot_dimension_numbers<[1], [0], [0], [1], [0, 0, 1, 1], [], []>} : vector<8x8xbf16>, vector<8x8xbf16>, vector<8x8xf32> -> vector<8x8xf32>
      %135 = arith.truncf %134 : vector<8x8xf32> to vector<8x8xbf16>
      %c0_53 = arith.constant 0 : index
      %c16 = arith.constant 16 : index
      %136 = vector.load %arg18[%c0_53, %c16] : memref<8x32xbf16, #tpu.memory_space<vmem>>, vector<8x8xbf16>
      tpu.vector_store %arg18[%c0_53, %c16], %135 {strides = array<i32>} : memref<8x32xbf16, #tpu.memory_space<vmem>>, vector<8x8xbf16>,
      %137 = vector.extract_strided_slice %63 {offsets = [0, 24], sizes = [8, 8], strides = [1, 1]} : vector<8x32xbf16> to vector<8x8xbf16>
      %138 = vector.extract_strided_slice %65 {offsets = [0, 24], sizes = [8, 8], strides = [1, 1]} : vector<8x32xbf16> to vector<8x8xbf16>
      %139 = vector.extract_strided_slice %67 {offsets = [0, 24], sizes = [8, 8], strides = [1, 1]} : vector<8x32xbf16> to vector<8x8xbf16>
      %cst_54 = arith.constant dense<0.000000e+00> : vector<8x8xf32>
      %140 = tpu.matmul %137, %138, %cst_54 {dimension_numbers = #tpu.dot_dimension_numbers<[1], [1], [0], [0], [0, 0, 1, 0], [], []>} : vector<8x8xbf16>, vector<8x8xbf16>, vector<8x8xf32> -> vector<8x8xf32>
      %141 = arith.addf %140, %73 : vector<8x8xf32>
      %cst_55 = arith.constant -3.40282347E+38 : f32
      %142 = vector.broadcast %cst_55 : f32 to vector<8x8xf32>
      %143 = arith.maximumf %141, %142 : vector<8x8xf32>
      %cst_56 = arith.constant dense<0xFF800000> : vector<8xf32>
      %144 = vector.multi_reduction <maximumf>, %143, %cst_56 [1] : vector<8x8xf32> to vector<8xf32>
      %145 = vector.shape_cast %144 : vector<8xf32> to vector<8x1xf32>
      %146 = vector.broadcast %145 : vector<8x1xf32> to vector<8x8xf32>
      %147 = arith.subf %143, %146 : vector<8x8xf32>
      %148 = math.exp %147 : vector<8x8xf32>
      %cst_57 = arith.constant dense<0.000000e+00> : vector<8xf32>
      %149 = vector.multi_reduction <add>, %148, %cst_57 [1] : vector<8x8xf32> to vector<8xf32>
      %150 = vector.shape_cast %149 : vector<8xf32> to vector<8x1xf32>
      %151 = tpu.reciprocal %150 {approx = true} : vector<8x1xf32> -> vector<8x1xf32>
      %152 = vector.broadcast %151 : vector<8x1xf32> to vector<8x8xf32>
      %153 = arith.mulf %148, %152 : vector<8x8xf32>
      %154 = arith.truncf %153 : vector<8x8xf32> to vector<8x8xbf16>
      %cst_58 = arith.constant dense<0.000000e+00> : vector<8x8xf32>
      %155 = tpu.matmul %154, %139, %cst_58 {dimension_numbers = #tpu.dot_dimension_numbers<[1], [0], [0], [1], [0, 0, 1, 1], [], []>} : vector<8x8xbf16>, vector<8x8xbf16>, vector<8x8xf32> -> vector<8x8xf32>
      %156 = arith.truncf %155 : vector<8x8xf32> to vector<8x8xbf16>
      %c0_59 = arith.constant 0 : index
      %c24 = arith.constant 24 : index
      %157 = vector.load %arg18[%c0_59, %c24] : memref<8x32xbf16, #tpu.memory_space<vmem>>, vector<8x8xbf16>
      tpu.vector_store %arg18[%c0_59, %c24], %156 {strides = array<i32>} : memref<8x32xbf16, #tpu.memory_space<vmem>>, vector<8x8xbf16>,
      %c0_60 = arith.constant 0 : index
      %c0_61 = arith.constant 0 : index
      %158 = vector.load %arg18[%c0_60, %c0_61] : memref<8x32xbf16, #tpu.memory_space<vmem>>, vector<8x32xbf16>
      %c0_62 = arith.constant 0 : index
      %c0_63 = arith.constant 0 : index
      %159 = vector.load %arg7[%c0_62, %c0_63] : memref<32x32xbf16, #tpu.memory_space<vmem>>, vector<32x32xbf16>
      %cst_64 = arith.constant dense<0.000000e+00> : vector<8x32xf32>
      %160 = tpu.matmul %158, %159, %cst_64 {dimension_numbers = #tpu.dot_dimension_numbers<[1], [0], [0], [1], [0, 0, 1, 1], [], []>} : vector<8x32xbf16>, vector<32x32xbf16>, vector<8x32xf32> -> vector<8x32xf32>
      %161 = arith.addf %23, %160 : vector<8x32xf32>
      %c0_65 = arith.constant 0 : index
      %c0_66 = arith.constant 0 : index
      %162 = vector.load %arg8[%c0_65, %c0_66] : memref<1x32xf32, #tpu.memory_space<vmem>>, vector<1x32xf32>
      %163 = vector.shape_cast %162 : vector<1x32xf32> to vector<32xf32>
      %164 = vector.shape_cast %163 : vector<32xf32> to vector<1x32xf32>
      %165 = vector.broadcast %164 : vector<1x32xf32> to vector<8x32xf32>
      %166 = arith.addf %161, %165 : vector<8x32xf32>
      %c0_67 = arith.constant 0 : index
      %c0_68 = arith.constant 0 : index
      %167 = vector.load %arg16[%c0_67, %c0_68] : memref<8x32xf32, #tpu.memory_space<vmem>>, vector<8x32xf32>
      tpu.vector_store %arg16[%c0_67, %c0_68], %166 {strides = array<i32>} : memref<8x32xf32, #tpu.memory_space<vmem>>, vector<8x32xf32>,
      %c0_69 = arith.constant 0 : index
      %c0_70 = arith.constant 0 : index
      %168 = vector.load %arg9[%c0_69, %c0_70] : memref<1x32xf32, #tpu.memory_space<vmem>>, vector<1x32xf32>
      %169 = vector.shape_cast %168 : vector<1x32xf32> to vector<32xf32>
      %c0_71 = arith.constant 0 : index
      %c0_72 = arith.constant 0 : index
      %170 = vector.load %arg10[%c0_71, %c0_72] : memref<1x32xf32, #tpu.memory_space<vmem>>, vector<1x32xf32>
      %171 = vector.shape_cast %170 : vector<1x32xf32> to vector<32xf32>
      %cst_73 = arith.constant dense<0.000000e+00> : vector<8xf32>
      %172 = vector.multi_reduction <add>, %166, %cst_73 [1] : vector<8x32xf32> to vector<8xf32>
      %173 = vector.shape_cast %172 : vector<8xf32> to vector<8x1xf32>
      %cst_74 = arith.constant 3.200000e+01 : f32
      %174 = vector.broadcast %cst_74 : f32 to vector<8x1xf32>
      %175 = arith.divf %173, %174 : vector<8x1xf32>
      %176 = vector.broadcast %175 : vector<8x1xf32> to vector<8x32xf32>
      %177 = arith.subf %166, %176 : vector<8x32xf32>
      %178 = arith.mulf %177, %177 : vector<8x32xf32>
      %cst_75 = arith.constant dense<0.000000e+00> : vector<8xf32>
      %179 = vector.multi_reduction <add>, %178, %cst_75 [1] : vector<8x32xf32> to vector<8xf32>
      %180 = vector.shape_cast %179 : vector<8xf32> to vector<8x1xf32>
      %cst_76 = arith.constant 3.200000e+01 : f32
      %181 = vector.broadcast %cst_76 : f32 to vector<8x1xf32>
      %182 = arith.divf %180, %181 : vector<8x1xf32>
      %183 = vector.broadcast %175 : vector<8x1xf32> to vector<8x32xf32>
      %184 = arith.subf %166, %183 : vector<8x32xf32>
      %cst_77 = arith.constant 9.99999974E-6 : f32
      %185 = vector.broadcast %cst_77 : f32 to vector<8x1xf32>
      %186 = arith.addf %182, %185 : vector<8x1xf32>
      %187 = math.rsqrt %186 : vector<8x1xf32>
      %188 = vector.broadcast %187 : vector<8x1xf32> to vector<8x32xf32>
      %189 = arith.mulf %184, %188 : vector<8x32xf32>
      %190 = vector.shape_cast %169 : vector<32xf32> to vector<1x32xf32>
      %191 = vector.broadcast %190 : vector<1x32xf32> to vector<8x32xf32>
      %192 = arith.mulf %189, %191 : vector<8x32xf32>
      %193 = vector.shape_cast %171 : vector<32xf32> to vector<1x32xf32>
      %194 = vector.broadcast %193 : vector<1x32xf32> to vector<8x32xf32>
      %195 = arith.addf %192, %194 : vector<8x32xf32>
      %196 = arith.truncf %195 : vector<8x32xf32> to vector<8x32xbf16>
      %c0_78 = arith.constant 0 : index
      %c0_79 = arith.constant 0 : index
      %197 = vector.load %arg17[%c0_78, %c0_79] : memref<8x32xbf16, #tpu.memory_space<vmem>>, vector<8x32xbf16>
      tpu.vector_store %arg17[%c0_78, %c0_79], %196 {strides = array<i32>} : memref<8x32xbf16, #tpu.memory_space<vmem>>, vector<8x32xbf16>,
      %cst_80 = arith.constant 0.000000e+00 : f32
      %198 = vector.broadcast %cst_80 : f32 to vector<8x32xf32>
      %c0_81 = arith.constant 0 : index
      %c0_82 = arith.constant 0 : index
      %199 = vector.load %arg19[%c0_81, %c0_82] : memref<8x32xf32, #tpu.memory_space<vmem>>, vector<8x32xf32>
      tpu.vector_store %arg19[%c0_81, %c0_82], %198 {strides = array<i32>} : memref<8x32xf32, #tpu.memory_space<vmem>>, vector<8x32xf32>,
    } else {
    }
    %c0 = arith.constant 0 : index
    %c0_1 = arith.constant 0 : index
    %3 = vector.load %arg17[%c0, %c0_1] : memref<8x32xbf16, #tpu.memory_space<vmem>>, vector<8x32xbf16>
    %c0_2 = arith.constant 0 : index
    %c0_3 = arith.constant 0 : index
    %4 = vector.load %arg11[%c0_2, %c0_3] : memref<32x128xbf16, #tpu.memory_space<vmem>>, vector<32x128xbf16>
    %cst = arith.constant dense<0.000000e+00> : vector<8x128xf32>
    %5 = tpu.matmul %3, %4, %cst {dimension_numbers = #tpu.dot_dimension_numbers<[1], [0], [0], [1], [0, 0, 1, 1], [], []>} : vector<8x32xbf16>, vector<32x128xbf16>, vector<8x128xf32> -> vector<8x128xf32>
    %c0_4 = arith.constant 0 : index
    %c0_5 = arith.constant 0 : index
    %6 = vector.load %arg12[%c0_4, %c0_5] : memref<1x128xf32, #tpu.memory_space<vmem>>, vector<1x128xf32>
    %7 = vector.shape_cast %6 : vector<1x128xf32> to vector<128xf32>
    %8 = vector.shape_cast %7 : vector<128xf32> to vector<1x128xf32>
    %9 = vector.broadcast %8 : vector<1x128xf32> to vector<8x128xf32>
    %10 = arith.addf %5, %9 : vector<8x128xf32>
    %cst_6 = arith.constant 0.000000e+00 : f32
    %11 = vector.broadcast %cst_6 : f32 to vector<8x128xf32>
    %12 = arith.maximumf %10, %11 : vector<8x128xf32>
    %c0_7 = arith.constant 0 : index
    %c0_8 = arith.constant 0 : index
    %13 = vector.load %arg19[%c0_7, %c0_8] : memref<8x32xf32, #tpu.memory_space<vmem>>, vector<8x32xf32>
    %14 = arith.truncf %12 : vector<8x128xf32> to vector<8x128xbf16>
    %c0_9 = arith.constant 0 : index
    %c0_10 = arith.constant 0 : index
    %15 = vector.load %arg13[%c0_9, %c0_10] : memref<128x32xbf16, #tpu.memory_space<vmem>>, vector<128x32xbf16>
    %cst_11 = arith.constant dense<0.000000e+00> : vector<8x32xf32>
    %16 = tpu.matmul %14, %15, %cst_11 {dimension_numbers = #tpu.dot_dimension_numbers<[1], [0], [0], [1], [0, 0, 1, 1], [], []>} : vector<8x128xbf16>, vector<128x32xbf16>, vector<8x32xf32> -> vector<8x32xf32>
    %17 = arith.addf %13, %16 : vector<8x32xf32>
    %c0_12 = arith.constant 0 : index
    %c0_13 = arith.constant 0 : index
    %18 = vector.load %arg19[%c0_12, %c0_13] : memref<8x32xf32, #tpu.memory_space<vmem>>, vector<8x32xf32>
    tpu.vector_store %arg19[%c0_12, %c0_13], %17 {strides = array<i32>} : memref<8x32xf32, #tpu.memory_space<vmem>>, vector<8x32xf32>,
    %c1_i32 = arith.constant 1 : i32
    %19 = arith.cmpi eq, %arg1, %c1_i32 : i32
    %20 = arith.extui %19 : i1 to i32
    %c0_i32_14 = arith.constant 0 : i32
    %21 = arith.cmpi ne, %20, %c0_i32_14 : i32
    scf.if %21 {
      %c0_15 = arith.constant 0 : index
      %c0_16 = arith.constant 0 : index
      %22 = vector.load %arg16[%c0_15, %c0_16] : memref<8x32xf32, #tpu.memory_space<vmem>>, vector<8x32xf32>
      %c0_17 = arith.constant 0 : index
      %c0_18 = arith.constant 0 : index
      %23 = vector.load %arg19[%c0_17, %c0_18] : memref<8x32xf32, #tpu.memory_space<vmem>>, vector<8x32xf32>
      %24 = arith.addf %22, %23 : vector<8x32xf32>
      %c0_19 = arith.constant 0 : index
      %c0_20 = arith.constant 0 : index
      %25 = vector.load %arg14[%c0_19, %c0_20] : memref<1x32xf32, #tpu.memory_space<vmem>>, vector<1x32xf32>
      %26 = vector.shape_cast %25 : vector<1x32xf32> to vector<32xf32>
      %27 = vector.shape_cast %26 : vector<32xf32> to vector<1x32xf32>
      %28 = vector.broadcast %27 : vector<1x32xf32> to vector<8x32xf32>
      %29 = arith.addf %24, %28 : vector<8x32xf32>
      %c0_21 = arith.constant 0 : index
      %c0_22 = arith.constant 0 : index
      %c0_23 = arith.constant 0 : index
      %30 = vector.load %arg15[%c0_21, %c0_22, %c0_23] : memref<1x8x32xf32, #tpu.memory_space<vmem>>, vector<1x8x32xf32>
      %31 = vector.shape_cast %30 : vector<1x8x32xf32> to vector<8x32xf32>
      %32 = vector.shape_cast %29 : vector<8x32xf32> to vector<1x8x32xf32>
      tpu.vector_store %arg15[%c0_21, %c0_22, %c0_23], %32 {strides = array<i32>} : memref<1x8x32xf32, #tpu.memory_space<vmem>>, vector<1x8x32xf32>,
    } else {
    }
    return
  }
  func.func @transform_0(%arg0: i32, %arg1: i32) -> (i32, i32, i32) {
    %c0_i32 = arith.constant 0 : i32
    %c0_i32_0 = arith.constant 0 : i32
    %c0_i32_1 = arith.constant 0 : i32
    return %arg0, %c0_i32, %c0_i32_0 : i32, i32, i32
  }
  func.func @transform_1(%arg0: i32, %arg1: i32) -> (i32, i32) {
    %c0_i32 = arith.constant 0 : i32
    %c0_i32_0 = arith.constant 0 : i32
    %c0_i32_1 = arith.constant 0 : i32
    return %c0_i32, %c0_i32_0 : i32, i32
  }
  func.func @transform_2(%arg0: i32, %arg1: i32) -> (i32, i32) {
    %c0_i32 = arith.constant 0 : i32
    %c0_i32_0 = arith.constant 0 : i32
    %c0_i32_1 = arith.constant 0 : i32
    return %c0_i32, %c0_i32_0 : i32, i32
  }
  func.func @transform_3(%arg0: i32, %arg1: i32) -> (i32, i32) {
    %c0_i32 = arith.constant 0 : i32
    %c0_i32_0 = arith.constant 0 : i32
    %c0_i32_1 = arith.constant 0 : i32
    return %c0_i32, %c0_i32_0 : i32, i32
  }
  func.func @transform_4(%arg0: i32, %arg1: i32) -> (i32, i32) {
    %c0_i32 = arith.constant 0 : i32
    %c0_i32_0 = arith.constant 0 : i32
    %c0_i32_1 = arith.constant 0 : i32
    return %c0_i32, %c0_i32_0 : i32, i32
  }
  func.func @transform_5(%arg0: i32, %arg1: i32) -> (i32, i32) {
    %c0_i32 = arith.constant 0 : i32
    %c0_i32_0 = arith.constant 0 : i32
    %c0_i32_1 = arith.constant 0 : i32
    return %c0_i32, %c0_i32_0 : i32, i32
  }
  func.func @transform_6(%arg0: i32, %arg1: i32) -> (i32, i32) {
    %c0_i32 = arith.constant 0 : i32
    %c0_i32_0 = arith.constant 0 : i32
    %c0_i32_1 = arith.constant 0 : i32
    return %c0_i32, %c0_i32_0 : i32, i32
  }
  func.func @transform_7(%arg0: i32, %arg1: i32) -> (i32, i32) {
    %c0_i32 = arith.constant 0 : i32
    %c0_i32_0 = arith.constant 0 : i32
    %c0_i32_1 = arith.constant 0 : i32
    return %c0_i32, %c0_i32_0 : i32, i32
  }
  func.func @transform_8(%arg0: i32, %arg1: i32) -> (i32, i32) {
    %c0_i32 = arith.constant 0 : i32
    %c0_i32_0 = arith.constant 0 : i32
    %c0_i32_1 = arith.constant 0 : i32
    return %c0_i32, %c0_i32_0 : i32, i32
  }
  func.func @transform_9(%arg0: i32, %arg1: i32) -> (i32, i32) {
    %c0_i32 = arith.constant 0 : i32
    %c0_i32_0 = arith.constant 0 : i32
    return %c0_i32, %arg1 : i32, i32
  }
  func.func @transform_10(%arg0: i32, %arg1: i32) -> (i32, i32) {
    %c0_i32 = arith.constant 0 : i32
    %c0_i32_0 = arith.constant 0 : i32
    return %c0_i32, %arg1 : i32, i32
  }
  func.func @transform_11(%arg0: i32, %arg1: i32) -> (i32, i32) {
    %c0_i32 = arith.constant 0 : i32
    %c0_i32_0 = arith.constant 0 : i32
    return %arg1, %c0_i32 : i32, i32
  }
  func.func @transform_12(%arg0: i32, %arg1: i32) -> (i32, i32) {
    %c0_i32 = arith.constant 0 : i32
    %c0_i32_0 = arith.constant 0 : i32
    %c0_i32_1 = arith.constant 0 : i32
    return %c0_i32, %c0_i32_0 : i32, i32
  }
  func.func @transform_13(%arg0: i32, %arg1: i32) -> (i32, i32, i32) {
    %c0_i32 = arith.constant 0 : i32
    %c0_i32_0 = arith.constant 0 : i32
    %c0_i32_1 = arith.constant 0 : i32
    return %arg0, %c0_i32, %c0_i32_0 : i32, i32, i32
  }
}

</mosaic_0001>

<bundles_post_ra>
// kernel: tpu_custom_call.1
= control target key start
LH: loop header
LB: loop body
LE: loop exit
PB: predicated region body
PF: predicated region fallthrough
CT: control target
= control target key end

     0   :  { %s2417_s0 = inlined_call_operand.vmem [shape: f32[2,8,32], index: 0, kind: input, shape index: {}]   ;;  %s2418_s1 = inlined_call_operand.vmem [shape: f32[1,32], index: 1, kind: input, shape index: {}]   ;;  %s2419_s2 = inlined_call_operand.vmem [shape: f32[1,32], index: 2, kind: input, shape index: {}]   ;;  %s2420_s3 = inlined_call_operand.vmem [shape: bf16[32,96], index: 3, kind: input, shape index: {}]   ;;  %s2421_s4 = inlined_call_operand.vmem [shape: f32[1,96], index: 4, kind: input, shape index: {}]   ;;  %s2422_s5 = inlined_call_operand.vmem [shape: bf16[32,32], index: 5, kind: input, shape index: {}]   ;;  %s2423_s6 = inlined_call_operand.vmem [shape: f32[1,32], index: 6, kind: input, shape index: {}]   ;;  %s2424_s7 = inlined_call_operand.vmem [shape: f32[1,32], index: 7, kind: input, shape index: {}]   ;;  %s2425_s8 = inlined_call_operand.vmem [shape: f32[1,32], index: 8, kind: input, shape index: {}]   ;;  %s2426_s9 = inlined_call_operand.vmem [shape: bf16[32,256], index: 9, kind: input, shape index: {}]   ;;  %s2427_s10 = inlined_call_operand.vmem [shape: f32[1,256], index: 10, kind: input, shape index: {}]   ;;  %s2428_s11 = inlined_call_operand.vmem [shape: bf16[256,32], index: 11, kind: input, shape index: {}]   ;;  %s2429_s12 = inlined_call_operand.vmem [shape: f32[1,32], index: 12, kind: input, shape index: {}]   ;;  %s2430_s13 = inlined_call_operand.hbm [shape: f32[2,8,32], index: 13, kind: output, shape index: {}]  }
   0x1   :  { %2443 = sst [smem:[#allocation21_spill]] %s2424_s7 }
   0x2   :  { %2444 = sst [smem:[#allocation22_spill]] %s2425_s8 }
   0x3   :  { %2445 = sst [smem:[#allocation23_spill]] %s2426_s9 }
   0x4   :  { %2446 = sst [smem:[#allocation24_spill]] %s2429_s12 }
   0x5   :  { %2447 = sst [smem:[#allocation25_spill]] %s2430_s13 }
   0x6   :  { %18 = vsyncpa [#allocation8], 0 }
   0x7   :  { %20 = vsyncpa [#allocation8 + $0x1], 0  ;;  %s2090_s25 = smov 0   ;;  %s2092_s26 = smov 0  }
   0x8   :  { %s2094_s27 = smov 0   ;;  %s2096_s28 = smov 0  }
   0x9   :  { %s2098_s29 = smov 0   ;;  %s2100_s30 = smov 0  }
   0xa   :  { %s2102_s14 = smov 0   ;;  %s2104_s15 = smov 0  }
   0xb   :  { %s2106_s16 = smov 0   ;;  %s2108_s17 = smov 0  }
   0xc LB: > { %2448 = sst [smem:[#allocation10_spill]] %s1962_s25  ;;  %s1565_s18 = sadd.s32 4294967295, %s1998_s17   ;;  %s1998_s17 = sphi %s2108_s17, %s26_s17   ;;  %s1994_s16 = sphi %s2106_s16, %s2478_s16   ;;  %s1990_s15 = sphi %s2104_s15, %s2477_s15   ;;  %s1986_s14 = sphi %s2102_s14, %s2476_s14   ;;  %s1982_s30 = sphi %s2100_s30, %s2475_s30   ;;  %s1978_s29 = sphi %s2098_s29, %s2474_s29   ;;  %s1974_s28 = sphi %s2096_s28, %s2473_s28   ;;  %s1970_s27 = sphi %s2094_s27, %s2472_s27   ;;  %s1966_s26 = sphi %s2092_s26, %s2480_s26   ;;  %s1962_s25 = sphi %s2090_s25, %s2479_s25  }
   0xd   : > { %2449 = sst [smem:[#allocation11_spill]] %s1970_s27  ;;  %s1566_s19 = sadd.s32 4294967294, %s1998_s17  }
   0xe   : > { %2450 = sst [smem:[#allocation12_spill]] %s1978_s29  ;;  %s35_s20 = sadd.s32 1, %s1990_s15 }
   0xf   : > { %2451 = sst [smem:[#allocation13_spill]] %s1990_s15  ;;  %s38_s21 = sadd.s32 1, %s1994_s16 }
  0x10   : > { %2452 = sst [smem:[#allocation14_spill]] %s1994_s16  ;;  %p36_p0 = scmp.ge.s32.totalorder %s35_s20, 2 }
  0x11   : > { %2453 = sst [smem:[#allocation15_spill]] %s1998_s17  ;;  %s239_s22 = sadd.s32 1, %s1978_s29 }
  0x12   : > { %p246_p1 = scmp.ne.s32.totalorder %s1978_s29, %s1974_s28  ;;  %p247_p2 = scmp.eq.s32.totalorder %s1998_s17, 0 }
  0x13   : > { %s2482_s20 = smov (%p36_p0, %s35_s20), 0  ;;  %s2484_s21 = smov (!%p36_p0, %s38_s21), %s1994_s16 }
  0x14   : > { %2454 = sst [smem:[#allocation16_spill]] %s2482_s20  ;;  %s236_s23 = ssub.s32 %s1990_s15, %s2482_s20 }
  0x15   : > { %p2153_p3 = por %p247_p2, %p246_p1  ;;  %p40_p4 = scmp.ge.s32.totalorder %s2484_s21, 2 }
  0x16   : > { %p237_p5 = scmp.eq.s32.totalorder %s236_s23, 0  ;;  %s338_s13 = sadd.s32 1, %s1970_s27 }
  0x17   : > { %p348_p6 = scmp.ne.s32.totalorder %s1970_s27, %s1966_s26  ;;  %s2486_s21 = smov (%p40_p4, %s2484_s21), 0 }
  0x18   : > { %2456 = sst [smem:[#allocation17_spill]] %s2486_s21  ;;  %s335_s8 = ssub.s32 %s1994_s16, %s2486_s21 }
  0x19   : > { %s2163_s12 = scalar_select %p237_p5, %s1978_s29, %s239_s22  }
  0x1a   : > { %p349_p7 = scmp.eq.s32.totalorder %s1565_s18, 3  ;;  %p336_p8 = scmp.eq.s32.totalorder %s335_s8, 0 }
  0x1b   : > { %2457 = sst [smem:[#allocation18_spill]] %s2163_s12  ;;  %p354_p9 = scmp.ne.s32.totalorder %s1966_s26, %s1962_s25 }
  0x1c   : > { %p2169_p10 = por %p349_p7, %p348_p6  ;;  %p355_p11 = scmp.eq.s32.totalorder %s1566_s19, 3 }
  0x1d   : > { %s2174_s20 = scalar_select %p336_p8, %s1970_s27, %s338_s13  }
  0x1e   : > { %p2176_p12 = por %p355_p11, %p354_p9  ;;  %p1568_p13 = scmp.ge.s32.totalorder %s1998_s17, 4 }
  0x1f   : > { %2459 = sst [smem:[#allocation19_spill]] %s2174_s20 }
  0x20   : > { %s2460_s23 = scalar_select %p2176_p12, 1, 0 }
  0x21   : > { %398 = sbr.rel (%p1568_p13) target bundleno = 52 (0x34), region = 52 }
  0x22   : > { %2461 = sst [smem:[#allocation20_spill]] %s2460_s23 }
  0x28   : > { %408 = sbr.rel (!%p2153_p3) target bundleno = 52 (0x34), region = 60  ;;  %s410_s8 = sand.u32 (%p2153_p3), 1, %s1978_s29  }
  0x29   : > { %s1570_s18 = sshll.u32 (%p2153_p3), %s1990_s15, 2  ;;  %s1569_s22 = sshll.u32 (%p2153_p3), %s410_s8, 4 }
  0x2a   : > { %s2462_s9 = sld [smem:[#allocation23_spill]] (%p2153_p3)  ;;  %s412_s19 = scalar_lea.vmem (%p2153_p3), [#allocation6], %s1569_s22 }
  0x30   : > { %s414_s13 = scalar_lea.vmem %s2462_s9, %s1570_s18 }
  0x31   : > { %v430_v0 = vld [vmem:[%s414_s13] sm:$0xf]  ;;  %v432_v1 = vld [vmem:[%s414_s13 + $0x8] sm:$0xf]  ;;  %v434_v2 = vld [vmem:[%s414_s13 + $0x10] sm:$0xf] }
  0x32   : > { %431 = vst [vmem:[%s412_s19] sm:$0xf] %v430_v0  ;;  %433 = vst [vmem:[%s412_s19 + $0x4] sm:$0xf] %v432_v1  ;;  %v436_v3 = vld [vmem:[%s414_s13 + $0x18] sm:$0xf] }
  0x33   : > { %435 = vst [vmem:[%s412_s19 + $0x8] sm:$0xf] %v434_v2  ;;  %437 = vst [vmem:[%s412_s19 + $0xc] sm:$0xf] %v436_v3 }
  0x34 PF: > { %p1571_p0 = scmp.ge.s32.totalorder %s1998_s17, 1  ;;  %p482_p1 = scmp.lt.s32.totalorder %s1998_s17, 5 }
  0x36   : > { %p483_p2 = pnand %p1571_p0, %p482_p1 }
  0x37   : > { %s489_s16 = sand.u32 (!%p483_p2), 1, %s1974_s28   ;;  %s2437_s21 = sand.u32 (!%p483_p2), 1, %s1966_s26  }
  0x38   : > { %486 = sbr.rel (%p483_p2) target bundleno = 2664 (0xa68), region = 109  ;;  %s2192_s24 = sshll.u32 (!%p483_p2), %s489_s16, 4 }
  0x39   : > { %s2196_s8 = sshll.u32 (!%p483_p2), %s2437_s21, 3  ;;  %p544_p3 = scmp.lt.s32.totalorder (!%p483_p2), %s1986_s14, 1 }
  0x3a   : > { %p548_p4 = scmp.lt.s32.totalorder (!%p483_p2), %s1982_s30, 1  ;;  %s1575_s18 = sshll.u32 (!%p483_p2), %s1982_s30, 4 }
  0x3b   : > { %p552_p5 = scmp.lt.s32.totalorder (!%p483_p2), %s1575_s18, 31  ;;  %s491_s25 = scalar_lea.vmem (!%p483_p2), [#allocation6], %s2192_s24 }
  0x3c   : > { %s543_s17 = scalar_lea.vmem (!%p483_p2), [#allocation7], %s2196_s8  ;;  %p1577_p6 = scmp.ne.s32.totalorder (!%p483_p2), %s1982_s30, 0 }
  0x3f   : > { %s545_s22 = scalar_select %p544_p3, %s1986_s14, 1 }
  0x40   : > { %s2203_s13 = scalar_select %p548_p4, %s1982_s30, 1 }
  0x41   : > { %s1574_s19 = sshll.u32 %s545_s22, 3  ;;  %s2488_s18 = smov (!%p552_p5, %s1575_s18), 31  ;;  %vm565_vm0 = vcmask (!%p1577_p6), 261120   ;;  %v2000_v6 = vmov (!%p1577_p6), 0.0   ;;  %v1854_v12 = vld [vmem:[%s2420_s3] sm:$0xff] (!%p1577_p6)   ;;  %vm2001_vm1 = vmmov (!%p1577_p6), 0   ;;  %v664_v44 = vlaneseq (!%p1577_p6) }
  0x42   : > { %s547_s28 = scalar_lea.vmem %s2417_s0, %s1574_s19  ;;  %s550_s29 = scalar_lea.vmem %s2427_s10, %s2203_s13  ;;  %1248 = vst.msk [vmem:[#allocation5] sm:$0xff] (!%p1577_p6), %vm565_vm0, %v2000_v6  ;;  %1656 = vmatprep.subr.bf16.mxu0 (!%p1577_p6), %v2000_v6  ;;  %1664 = vmatprep.subr.bf16.mxu1 (!%p1577_p6), %v2000_v6  ;;  %v1855_v13 = vld [vmem:[%s2420_s3 + $0x8] sm:$0xff] (!%p1577_p6)   ;;  %v1578_v18 = vld [vmem:[%s2418_s1] ss:$0 sm:$0xff] (!%p1577_p6)  ;;  %vm673_vm2 = vcmask (!%p1577_p6), 64512   ;;  %vm738_vm4 = vcmask (!%p1577_p6), 1043456  }
  0x43   : > { %s1576_s21 = sshll.u32 %s2488_s18, 2  ;;  %561 = sbr.rel (%p1577_p6) target bundleno = 2184 (0x888), region = 117  ;;  %v2220_v4 = vld [vmem:[%s547_s28] sm:$0xff] (!%p1577_p6)  ;;  %1660 = vmatprep.mubr.msk.bf16.mxu0 (!%p1577_p6), %vm2001_vm1, %v2000_v6  ;;  %1666 = vmatprep.mubr.msk.bf16.mxu1 (!%p1577_p6), %vm2001_vm1, %v2000_v6  ;;  %v665_v45 = vshrl.u32 (!%p1577_p6), %v664_v44, 7  ;;  %v667_v46 = vand.u32 (!%p1577_p6), 127, %v664_v44  ;;  %vm783_vm5 = vcmask (!%p1577_p6), 60416  }
  0x44   : > { %s2215_s23 = scalar_lea.vmem %s2428_s11, %s1576_s21  ;;  %v566_v5 = vsel (!%p1577_p6), %vm565_vm0, %v2220_v4, 0.0  ;;  %1657 = vmatpush3.bf16.msra.mxu0 (!%p1577_p6), %v1854_v12  ;;  %v1579_v20 = vld [vmem:[%s2419_s2] ss:$0 sm:$0xff] (!%p1577_p6)  ;;  %s2002_s16 = smov (!%p1577_p6), 96   ;;  %v2009_v47 = vmov (!%p1577_p6), -3.4028235e+38  }
  0x45   : > { %567 = vadd.xlane.f32.xlu0 (!%p1577_p6), %v566_v5  ;;  %1658 = vmatprep.subr.bf16.mxu0 (!%p1577_p6), %v2000_v6  ;;  %v1580_v24 = vld [vmem:[%s2421_s4] ss:$0 sm:$0xff] (!%p1577_p6)  ;;  %s2003_s9 = smov (!%p1577_p6), 120   ;;  %s2004_s12 = smov (!%p1577_p6), 88   ;;  %vm668_vm3 = vcmp.ge.s32.totalorder (!%p1577_p6), %v665_v45, %v667_v46  ;;  %vm904_vm6 = vcmask (!%p1577_p6), 126016   ;;  %vm1024_vm7 = vcmask (!%p1577_p6), 191616  }
  0x46   : > { %s2005_s27 = smov (!%p1577_p6), 80   ;;  %s2006_s15 = smov (!%p1577_p6), 112   ;;  %v669_v48 = vsel (!%p1577_p6), %vm668_vm3, 0.0, %v2009_v47  ;;  %vm1144_vm8 = vcmask (!%p1577_p6), 257216   ;;  %vm1246_vm9 = vcmask (!%p1577_p6), 257024  }
  0x47   : > { %s2007_s20 = smov (!%p1577_p6), 72   ;;  %s2008_s21 = smov (!%p1577_p6), 104  }
  0x48   : > { %1659 = vmatpush3.bf16.msra.mxu0 (!%p1577_p6), %v1855_v13  ;;  %s2010_s18 = smov (!%p1577_p6), 64   ;;  %s2011_s22 = smov (!%p1577_p6), 56  }
  0x49   : > { %1670 = vmatprep.subr.bf16.mxu0 (!%p1577_p6), %v2000_v6  ;;  %s2012_s19 = smov (!%p1577_p6), 48   ;;  %s2013_s28 = smov (!%p1577_p6), 40  }
  0xd2   : > { %v568_v7 = vpop.xlane.xlu0 %567 }
  0xd3   : > { %v570_v8 = vmul.f32 0.03125, %v568_v7 }
  0xd5   : > { %v571_v9 = vsub.f32 %v2220_v4, %v570_v8 }
  0xd7   : > { %v572_v10 = vmul.f32 %v571_v9, %v571_v9 }
  0xd9   : > { %v573_v11 = vsel %vm565_vm0, %v572_v10, 0.0 }
  0xda   : > { %574 = vadd.xlane.f32.xlu0 %v573_v11 }
 0x167   : > { %v575_v14 = vpop.xlane.xlu0 %574 }
 0x168   : > { %v576_v15 = vmul.f32 0.03125, %v575_v14 }
 0x16a   : > { %v577_v16 = vadd.f32 1e-05, %v576_v15 }
 0x16c   : > { %1858 = vrsqrt.f32 %v577_v16 }
 0x176   : > { %v1859_v17 = vpop.eup %1858 }
 0x177   : > { %v579_v19 = vmul.f32 %v1859_v17, %v571_v9 }
 0x179   : > { %v586_v21 = vmul.f32 %v1578_v18, %v579_v19 }
 0x17b   : > { %v593_v22 = vadd.f32 %v1579_v20, %v586_v21 }
 0x17d   : > { %v594_v23 = vpack.c.bf16 %v593_v22, %v593_v22 }
 0x17f   : > { %1661 = vmatmul.mubr.msk.bf16.vlgmr.msra.gmra.mrb[0].mxu0 %vm565_vm0, %v594_v23 }
 0x180   : > { %1672 = vmatprep.mubr.msk.bf16.mxu0 %vm2001_vm1, %v2000_v6 }
 0x252   : > { %v655_v25 = vpop.f32.mrb[0].mxu0 }
 0x253   : > { %v656_v26 = vadd.f32 %v1580_v24, %v655_v25  ;;  %v1662_v27 = vpop.f32.mrb[1].mxu0 }
 0x254   : > { %v658_v28 = vpop.f32.mrb[2].mxu0 }
 0x255   : > { %v661_v29 = vmul.f32 0.35355338, %v656_v26  ;;  %v2254_v30 = vpack.c.bf16 %v656_v26, %v656_v26  ;;  %v1663_v31 = vpop.f32.mrb[3].mxu0 }
 0x257   : > { %v662_v32 = vpack.c.bf16 %v661_v29, %v661_v29  ;;  %671 = vrot.lane.b32.xlu1 %v2254_v30, %s2002_s16  ;;  %s2014_s16 = smov 8  }
 0x259   : > { %786 = vrot.lane.b32.xlu0 %v662_v32, %s2003_s9 }
 0x25b   : > { %788 = vrot.lane.b32.xlu1 %v2254_v30, %s2004_s12 }
 0x25f   : > { %908 = vrot.lane.b32.xlu1 %v2254_v30, %s2005_s27  ;;  %s2464_s27 = sld [smem:[#allocation22_spill]] }
 0x263   : > { %906 = vrot.lane.b32.xlu1 %v662_v32, %s2006_s15 }
 0x267   : > { %1028 = vrot.lane.b32.xlu1 %v2254_v30, %s2007_s20  ;;  %s2015_s20 = smov 16  }
 0x26b   : > { %1026 = vrot.lane.b32.xlu1 %v662_v32, %s2008_s21  ;;  %s2016_s21 = smov 24  }
 0x2c9   : > { %v672_v33 = vpop.permute.xlu1 %671 }
 0x2ca   : > { %v678_v34 = vsel %vm673_vm2, %v672_v33, 0 }
 0x2cb   : > { %1665 = vmatpush3.bf16.xpose.msra.mxu1 %v678_v34  ;;  %v787_v38 = vpop.permute.xlu0 %786 }
 0x2cc   : > { %1676 = vmatprep.subr.bf16.mxu1 %v2000_v6 }
 0x2cd   : > { %v789_v35 = vpop.permute.xlu1 %788 }
 0x2ce   : > { %v794_v36 = vsel %vm673_vm2, %v789_v35, 0 }
 0x2d1   : > { %v909_v37 = vpop.permute.xlu1 %908 }
 0x2d2   : > { %1667 = vmatmul.mubr.msk.bf16.vlgmr.msra.gmra.mrb[0].mxu1 %vm673_vm2, %v662_v32  ;;  %v914_v40 = vsel %vm673_vm2, %v909_v37, 0 }
 0x2d3   : > { %1677 = vmatpush3.bf16.xpose.msra.mxu1 %v794_v36  ;;  %1678 = vmatprep.mubr.msk.bf16.mxu1 %vm2001_vm1, %v2000_v6 }
 0x2d4   : > { %1688 = vmatprep.subr.bf16.mxu1 %v2000_v6 }
 0x2d5   : > { %v907_v39 = vpop.permute.xlu1 %906 }
 0x2d9   : > { %v1029_v41 = vpop.permute.xlu1 %1028 }
 0x2da   : > { %1679 = vmatmul.mubr.msk.bf16.vlgmr.msra.gmra.mrb[4].mxu1 %vm673_vm2, %v787_v38  ;;  %v1034_v42 = vsel %vm673_vm2, %v1029_v41, 0 }
 0x2db   : > { %1689 = vmatpush3.bf16.xpose.msra.mxu1 %v914_v40  ;;  %1690 = vmatprep.mubr.msk.bf16.mxu1 %vm2001_vm1, %v2000_v6 }
 0x2dc   : > { %1700 = vmatprep.subr.bf16.mxu1 %v2000_v6 }
 0x2dd   : > { %v1027_v43 = vpop.permute.xlu1 %1026 }
 0x2e2   : > { %1691 = vmatmul.mubr.msk.bf16.vlgmr.msra.gmra.mrb[8].mxu1 %vm673_vm2, %v907_v39 }
 0x2e3   : > { %1701 = vmatpush3.bf16.xpose.msra.mxu1 %v1034_v42  ;;  %1702 = vmatprep.mubr.msk.bf16.mxu1 %vm2001_vm1, %v2000_v6 }
 0x2e4   : > { %1712 = vmatprep.subr.bf16.mxu1 %v2000_v6 }
 0x2ea   : > { %1703 = vmatmul.mubr.msk.bf16.vlgmr.msra.gmra.mrb[12].mxu1 %vm673_vm2, %v1027_v43 }
 0x2eb   : > { %1716 = vmatprep.mubr.msk.bf16.mxu1 %vm2001_vm1, %v2000_v6 }
 0x3a5   : > { %v714_v49 = vpop.f32.mrb[0].mxu1 }
 0x3a6   : > { %v715_v50 = vadd.f32 %v714_v49, %v669_v48  ;;  %v1668_v51 = vpop.f32.mrb[1].mxu1 }
 0x3a7   : > { %v717_v52 = vpop.f32.mrb[2].mxu1 }
 0x3a8   : > { %v720_v53 = vmax.f32 %v715_v50, -3.4028235e+38  ;;  %v1669_v54 = vpop.f32.mrb[3].mxu1 }
 0x3aa   : > { %v721_v55 = vsel %vm673_vm2, %v720_v53, -inf }
 0x3ab   : > { %722 = vmax.xlane.f32.xlu1 %v721_v55 }
 0x3ad   : > { %v830_v56 = vpop.f32.mrb[4].mxu1 }
 0x3ae   : > { %v831_v57 = vadd.f32 %v830_v56, %v669_v48  ;;  %v1680_v58 = vpop.f32.mrb[5].mxu1 }
 0x3af   : > { %v833_v59 = vpop.f32.mrb[6].mxu1 }
 0x3b0   : > { %v836_v60 = vmax.f32 %v831_v57, -3.4028235e+38  ;;  %v1681_v61 = vpop.f32.mrb[7].mxu1 }
 0x3b2   : > { %v837_v62 = vsel %vm673_vm2, %v836_v60, -inf }
 0x3b3   : > { %838 = vmax.xlane.f32.xlu0 %v837_v62 }
 0x3b5   : > { %v950_v63 = vpop.f32.mrb[8].mxu1 }
 0x3b6   : > { %v951_v0 = vadd.f32 %v950_v63, %v669_v48  ;;  %v1692_v1 = vpop.f32.mrb[9].mxu1 }
 0x3b7   : > { %v953_v2 = vpop.f32.mrb[10].mxu1 }
 0x3b8   : > { %v956_v3 = vmax.f32 %v951_v0, -3.4028235e+38  ;;  %v1693_v5 = vpop.f32.mrb[11].mxu1 }
 0x3ba   : > { %v957_v7 = vsel %vm673_vm2, %v956_v3, -inf }
 0x3bb   : > { %958 = vmax.xlane.f32.xlu1 %v957_v7  ;;  %v1856_v7 = vld [vmem:[%s2422_s5] sm:$0xff]  }
 0x3bc   : > { %1713 = vmatpush3.bf16.msra.mxu1 %v1856_v7 }
 0x3bd   : > { %v1070_v8 = vpop.f32.mrb[12].mxu1  ;;  %1714 = vmatprep.subr.bf16.mxu1 %v2000_v6 }
 0x3be   : > { %v1071_v9 = vadd.f32 %v1070_v8, %v669_v48  ;;  %v1704_v10 = vpop.f32.mrb[13].mxu1 }
 0x3bf   : > { %v1073_v11 = vpop.f32.mrb[14].mxu1 }
 0x3c0   : > { %v1076_v12 = vmax.f32 %v1071_v9, -3.4028235e+38  ;;  %v1705_v13 = vpop.f32.mrb[15].mxu1  ;;  %v1857_v9 = vld [vmem:[%s2422_s5 + $0x8] sm:$0xff]  }
 0x3c1   : > { %1715 = vmatpush3.bf16.msra.mxu1 %v1857_v9 }
 0x3c2   : > { %v1077_v14 = vsel %vm673_vm2, %v1076_v12, -inf }
 0x3c3   : > { %1078 = vmax.xlane.f32.xlu0 %v1077_v14 }
 0x438   : > { %v723_v15 = vpop.xlane.xlu1 %722 }
 0x439   : > { %v724_v16 = vsub.f32 %v720_v53, %v723_v15 }
 0x43b   : > { %v725_v17 = vmul.f32 1.442695, %v724_v16 }
 0x43d   : > { %1860 = vpow2.f32 %v725_v17 }
 0x440   : > { %v839_v18 = vpop.xlane.xlu0 %838 }
 0x441   : > { %v840_v19 = vsub.f32 %v836_v60, %v839_v18 }
 0x443   : > { %v841_v20 = vmul.f32 1.442695, %v840_v19 }
 0x445   : > { %1862 = vpow2.f32 %v841_v20 }
 0x447   : > { %v1861_v21 = vpop.eup %1860 }
 0x448   : > { %v727_v22 = vsel %vm673_vm2, %v1861_v21, 0.0  ;;  %v959_v31 = vpop.xlane.xlu1 %958 }
 0x449   : > { %728 = vadd.xlane.f32.xlu1 %v727_v22  ;;  %v960_v32 = vsub.f32 %v956_v3, %v959_v31 }
 0x44b   : > { %v961_v33 = vmul.f32 1.442695, %v960_v32 }
 0x44f   : > { %v1863_v23 = vpop.eup %1862 }
 0x450   : > { %v1079_v24 = vpop.xlane.xlu0 %1078  ;;  %v843_v25 = vsel %vm673_vm2, %v1863_v23, 0.0 }
 0x451   : > { %v1080_v26 = vsub.f32 %v1076_v12, %v1079_v24  ;;  %844 = vadd.xlane.f32.xlu0 %v843_v25 }
 0x453   : > { %v1081_v27 = vmul.f32 1.442695, %v1080_v26 }
 0x455   : > { %1864 = vpow2.f32 %v1081_v27 }
 0x456   : > { %1866 = vpow2.f32 %v961_v33 }
 0x45a   : > { %733 = vrot.lane.b32.xlu1 %v2254_v30, %s2010_s18 }
 0x45f   : > { %v1865_v28 = vpop.eup %1864 }
 0x460   : > { %v1083_v29 = vsel %vm673_vm2, %v1865_v28, 0.0  ;;  %v1867_v34 = vpop.eup %1866 }
 0x461   : > { %1084 = vadd.xlane.f32.xlu0 %v1083_v29  ;;  %v963_v35 = vsel %vm673_vm2, %v1867_v34, 0.0 }
 0x477   : > { %849 = vrot.lane.b32.xlu0 %v2254_v30, %s2011_s22 }
 0x47e   : > { %964 = vadd.xlane.f32.xlu1 %v963_v35 }
 0x48f   : > { %969 = vrot.lane.b32.xlu1 %v2254_v30, %s2012_s19 }
 0x493   : > { %1089 = vrot.lane.b32.xlu1 %v2254_v30, %s2013_s28 }
 0x4d6   : > { %v729_v36 = vpop.xlane.xlu1 %728 }
 0x4d7   : > { %1868 = vrcp.f32 %v729_v36 }
 0x4da   : > { %v734_v37 = vpop.permute.xlu1 %733 }
 0x4db   : > { %v740_v38 = vsel %vm738_vm4, %v734_v37, 0 }
 0x4dc   : > { %1671 = vmatpush3.bf16.msra.mxu0 %v740_v38 }
 0x4dd   : > { %1682 = vmatprep.subr.bf16.mxu0 %v2000_v6 }
 0x4de   : > { %v845_v40 = vpop.xlane.xlu0 %844 }
 0x4df   : > { %1870 = vrcp.f32 %v845_v40 }
 0x4e1   : > { %v1869_v39 = vpop.eup %1868 }
 0x4e2   : > { %v731_v41 = vmul.f32 %v1869_v39, %v1861_v21 }
 0x4e4   : > { %v732_v42 = vpack.c.bf16 %v731_v41, %v731_v41  ;;  %v1600_v41 = vld [vmem:[%s2464_s27] ss:$0 sm:$0xff] }
 0x4e6   : > { %1673 = vmatmul.mubr.msk.bf16.vlgmr.msra.gmra.mrb[4].mxu0 %vm673_vm2, %v732_v42 }
 0x4e7   : > { %1684 = vmatprep.mubr.msk.bf16.mxu0 %vm2001_vm1, %v2000_v6 }
 0x4e9   : > { %v1871_v30 = vpop.eup %1870 }
 0x4ea   : > { %v847_v44 = vmul.f32 %v1871_v30, %v1863_v23  ;;  %v1598_v23 = vld [vmem:[%s2423_s6] ss:$0 sm:$0xff] }
 0x4ec   : > { %v848_v47 = vpack.c.bf16 %v847_v44, %v847_v44 }
 0x4ee   : > { %v1085_v43 = vpop.xlane.xlu0 %1084 }
 0x4f2   : > { %v850_v45 = vpop.permute.xlu0 %849 }
 0x4f3   : > { %v855_v46 = vsel %vm738_vm4, %v850_v45, 0 }
 0x4f4   : > { %1683 = vmatpush3.bf16.msra.mxu0 %v855_v46 }
 0x4f5   : > { %1694 = vmatprep.subr.bf16.mxu0 %v2000_v6 }
 0x4f7   : > { %1685 = vmatmul.mubr.msk.bf16.vlgmr.msra.gmra.mrb[8].mxu0 %vm673_vm2, %v848_v47 }
 0x4f8   : > { %1696 = vmatprep.mubr.msk.bf16.mxu0 %vm2001_vm1, %v2000_v6 }
 0x50b   : > { %v965_v48 = vpop.xlane.xlu1 %964 }
 0x50c   : > { %1872 = vrcp.f32 %v965_v48 }
 0x50d   : > { %1874 = vrcp.f32 %v1085_v43 }
 0x50f   : > { %v970_v49 = vpop.permute.xlu1 %969 }
 0x510   : > { %v975_v50 = vsel %vm738_vm4, %v970_v49, 0 }
 0x511   : > { %1695 = vmatpush3.bf16.msra.mxu0 %v975_v50 }
 0x512   : > { %1706 = vmatprep.subr.bf16.mxu0 %v2000_v6 }
 0x513   : > { %v1090_v53 = vpop.permute.xlu1 %1089 }
 0x514   : > { %v1095_v56 = vsel %vm738_vm4, %v1090_v53, 0 }
 0x516   : > { %v1873_v51 = vpop.eup %1872 }
 0x517   : > { %v967_v52 = vmul.f32 %v1873_v51, %v1867_v34  ;;  %v1875_v55 = vpop.eup %1874 }
 0x518   : > { %v1087_v57 = vmul.f32 %v1875_v55, %v1865_v28 }
 0x519   : > { %v968_v54 = vpack.c.bf16 %v967_v52, %v967_v52 }
 0x51a   : > { %v1088_v58 = vpack.c.bf16 %v1087_v57, %v1087_v57 }
 0x51b   : > { %1697 = vmatmul.mubr.msk.bf16.vlgmr.msra.gmra.mrb[12].mxu0 %vm673_vm2, %v968_v54 }
 0x51c   : > { %1707 = vmatpush3.bf16.msra.mxu0 %v1095_v56  ;;  %1708 = vmatprep.mubr.msk.bf16.mxu0 %vm2001_vm1, %v2000_v6 }
 0x523   : > { %1709 = vmatmul.mubr.msk.bf16.vlgmr.msra.gmra.mrb[16].mxu0 %vm673_vm2, %v1088_v58 }
 0x5b9   : > { %v776_v59 = vpop.f32.mrb[4].mxu0 }
 0x5ba   : > { %v782_v60 = vpack.c.bf16 %v776_v59, %v776_v59  ;;  %v1674_v61 = vpop.f32.mrb[5].mxu0 }
 0x5bb   : > { %v779_v62 = vpop.f32.mrb[6].mxu0 }
 0x5bc   : > { %784 = vst.msk [vmem:[#allocation4] sm:$0xf] %vm783_vm5, %v782_v60  ;;  %v1675_v63 = vpop.f32.mrb[7].mxu0 }
 0x5ca   : > { %v891_v0 = vpop.f32.mrb[8].mxu0 }
 0x5cb   : > { %v1619_v1 = vpack.c.bf16 %v891_v0, %v891_v0  ;;  %v1686_v2 = vpop.f32.mrb[9].mxu0 }
 0x5cc   : > { %v894_v3 = vpop.f32.mrb[10].mxu0 }
 0x5cd   : > { %901 = vrot.lane.b32.xlu0 %v1619_v1, %s2014_s16  ;;  %v1687_v5 = vpop.f32.mrb[11].mxu0  ;;  %s2463_s16 = sld [smem:[#allocation21_spill]] }
 0x5d3   : > { %v1599_v39 = vld [vmem:[%s2463_s16] ss:$0 sm:$0xff] }
 0x5ee   : > { %v1011_v8 = vpop.f32.mrb[12].mxu0 }
 0x5ef   : > { %v1620_v10 = vpack.c.bf16 %v1011_v8, %v1011_v8  ;;  %v1698_v11 = vpop.f32.mrb[13].mxu0 }
 0x5f0   : > { %v1014_v12 = vpop.f32.mrb[14].mxu0 }
 0x5f1   : > { %1021 = vrot.lane.b32.xlu1 %v1620_v10, %s2015_s20  ;;  %v1699_v13 = vpop.f32.mrb[15].mxu0 }
 0x5f6   : > { %v1131_v14 = vpop.f32.mrb[16].mxu0 }
 0x5f7   : > { %v1621_v15 = vpack.c.bf16 %v1131_v14, %v1131_v14  ;;  %v1710_v16 = vpop.f32.mrb[17].mxu0 }
 0x5f8   : > { %v1134_v17 = vpop.f32.mrb[18].mxu0 }
 0x5f9   : > { %1141 = vrot.lane.b32.xlu0 %v1621_v15, %s2016_s21  ;;  %v1711_v18 = vpop.f32.mrb[19].mxu0 }
 0x63f   : > { %v902_v19 = vpop.permute.xlu0 %901 }
 0x640   : > { %905 = vst.msk [vmem:[#allocation4] sm:$0xf] %vm904_vm6, %v902_v19 }
 0x663   : > { %v1022_v20 = vpop.permute.xlu1 %1021 }
 0x664   : > { %1025 = vst.msk [vmem:[#allocation4] sm:$0xf] %vm1024_vm7, %v1022_v20 }
 0x66b   : > { %v1142_v6 = vpop.permute.xlu0 %1141 }
 0x66c   : > { %1145 = vst.msk [vmem:[#allocation4] sm:$0xf] %vm1144_vm8, %v1142_v6 }
 0x673   : > { %v1146_v21 = vld [vmem:[#allocation4] sm:$0xf] }
 0x674   : > { %1717 = vmatmul.mubr.msk.bf16.vlgmr.msra.gmra.mrb[16].mxu1 %vm565_vm0, %v1146_v21 }
 0x747   : > { %v1200_v22 = vpop.f32.mrb[16].mxu1 }
 0x748   : > { %v1206_v24 = vadd.f32 %v1200_v22, %v2220_v4  ;;  %v1718_v25 = vpop.f32.mrb[17].mxu1 }
 0x749   : > { %v1203_v26 = vpop.f32.mrb[18].mxu1 }
 0x74a   : > { %v1214_v27 = vadd.f32 %v1598_v23, %v1206_v24  ;;  %v1719_v28 = vpop.f32.mrb[19].mxu1 }
 0x74c   : > { %1215 = vst.msk [vmem:[#allocation2] sm:$0xff] %vm565_vm0, %v1214_v27  ;;  %v1218_v29 = vsel %vm565_vm0, %v1214_v27, 0.0 }
 0x74d   : > { %1219 = vadd.xlane.f32.xlu1 %v1218_v29 }
 0x7da   : > { %v1220_v31 = vpop.xlane.xlu1 %1219 }
 0x7db   : > { %v1221_v32 = vmul.f32 0.03125, %v1220_v31 }
 0x7dd   : > { %v1222_v33 = vsub.f32 %v1214_v27, %v1221_v32 }
 0x7df   : > { %v1223_v34 = vmul.f32 %v1222_v33, %v1222_v33 }
 0x7e1   : > { %v1224_v35 = vsel %vm565_vm0, %v1223_v34, 0.0 }
 0x7e2   : > { %1225 = vadd.xlane.f32.xlu0 %v1224_v35 }
 0x86f   : > { %v1226_v36 = vpop.xlane.xlu0 %1225 }
 0x870   : > { %v1227_v37 = vmul.f32 0.03125, %v1226_v36 }
 0x872   : > { %v1228_v38 = vadd.f32 1e-05, %v1227_v37 }
 0x874   : > { %1876 = vrsqrt.f32 %v1228_v38 }
 0x87e   : > { %v1877_v4 = vpop.eup %1876 }
 0x87f   : > { %v1230_v40 = vmul.f32 %v1877_v4, %v1222_v33 }
 0x881   : > { %v1237_v42 = vmul.f32 %v1599_v39, %v1230_v40 }
 0x883   : > { %v1244_v30 = vadd.f32 %v1600_v41, %v1237_v42 }
 0x885   : > { %v1245_v43 = vpack.c.bf16 %v1244_v30, %v1244_v30 }
 0x887   : > { %1247 = vst.msk [vmem:[#allocation3] sm:$0xf] %vm1246_vm9, %v1245_v43 }
 0x888 PF: > { %v1878_v44 = vld [vmem:[%s491_s25] sm:$0xff]   ;;  %v2017_v45 = vmov 0.0   ;;  %v1879_v46 = vld [vmem:[%s491_s25 + $0x8] sm:$0xff]   ;;  %vm2018_vm10 = vmmov 0   ;;  %vm1273_vm11 = vcmask 261120   ;;  %p1613_p7 = scmp.ne.s32.totalorder %s1982_s30, 1 }
 0x889   : > { %1720 = vmatprep.subr.bf16.mxu0 %v2017_v45  ;;  %1728 = vmatprep.subr.bf16.mxu1 %v2017_v45  ;;  %v1880_v47 = vld [vmem:[%s2215_s23] sm:$0xff]   ;;  %v1881_v48 = vld [vmem:[%s2215_s23 + $0x8] sm:$0xff]   ;;  %v1882_v50 = vld [vmem:[%s2215_s23 + $0x10] sm:$0xff]   ;;  %s2465_s13 = sld [smem:[#allocation24_spill]] (!%p1613_p7) }
 0x88a   : > { %1721 = vmatpush3.bf16.msra.mxu0 %v1878_v44  ;;  %1724 = vmatprep.mubr.msk.bf16.mxu0 %vm2018_vm10, %v2017_v45  ;;  %v1883_v51 = vld [vmem:[%s2215_s23 + $0x18] sm:$0xff]   ;;  %v1884_v52 = vld [vmem:[%s2215_s23 + $0x20] sm:$0xff]   ;;  %v1885_v53 = vld [vmem:[%s2215_s23 + $0x28] sm:$0xff]  }
 0x88b   : > { %1722 = vmatprep.subr.bf16.mxu0 %v2017_v45  ;;  %1744 = vmatprep.mubr.msk.bf16.mxu1 %vm2018_vm10, %v2017_v45  ;;  %v1886_v54 = vld [vmem:[%s2215_s23 + $0x30] sm:$0xff]   ;;  %v1887_v55 = vld [vmem:[%s2215_s23 + $0x38] sm:$0xff]   ;;  %v1601_v56 = vld [vmem:[%s550_s29] ss:$0 sm:$0xff] }
 0x88c   : > { %1729 = vmatpush3.bf16.msra.mxu1 %v1880_v47  ;;  %v1318_v0 = vld [vmem:[#allocation5] sm:$0xff]  ;;  %v1430_v8 = vld [vmem:[#allocation2] sm:$0xff] (!%p1613_p7) }
 0x88d   : > { %1730 = vmatprep.subr.bf16.mxu1 %v2017_v45 }
 0x88e   : > { %v1249_v49 = vld [vmem:[#allocation3] sm:$0xf]  ;;  %1723 = vmatpush3.bf16.msra.mxu0 %v1879_v46 }
 0x88f   : > { %v1614_v10 = vld [vmem:[%s2465_s13] ss:$0 sm:$0xff] (!%p1613_p7) }
 0x890   : > { %1731 = vmatpush3.bf16.msra.mxu1 %v1881_v48 }
 0x891   : > { %1725 = vmatmul.mubr.msk.bf16.vlgmr.msra.gmra.mrb[0].mxu0 %vm1273_vm11, %v1249_v49  ;;  %1732 = vmatprep.subr.bf16.mxu1 %v2017_v45 }
 0x894   : > { %1733 = vmatpush3.bf16.msra.mxu1 %v1882_v50 }
 0x895   : > { %1734 = vmatprep.subr.bf16.mxu1 %v2017_v45 }
 0x898   : > { %1735 = vmatpush3.bf16.msra.mxu1 %v1883_v51 }
 0x899   : > { %1736 = vmatprep.subr.bf16.mxu1 %v2017_v45 }
 0x89c   : > { %1737 = vmatpush3.bf16.msra.mxu1 %v1884_v52 }
 0x89d   : > { %1738 = vmatprep.subr.bf16.mxu1 %v2017_v45 }
 0x8a0   : > { %1739 = vmatpush3.bf16.msra.mxu1 %v1885_v53 }
 0x8a1   : > { %1740 = vmatprep.subr.bf16.mxu1 %v2017_v45 }
 0x8a4   : > { %1741 = vmatpush3.bf16.msra.mxu1 %v1886_v54 }
 0x8a5   : > { %1742 = vmatprep.subr.bf16.mxu1 %v2017_v45 }
 0x8a8   : > { %1743 = vmatpush3.bf16.msra.mxu1 %v1887_v55 }
 0x964   : > { %v1311_v57 = vpop.f32.mrb[0].mxu0 }
 0x965   : > { %v1312_v58 = vadd.f32 %v1601_v56, %v1311_v57  ;;  %v1726_v59 = vpop.f32.mrb[1].mxu0 }
 0x966   : > { %v1314_v60 = vpop.f32.mrb[2].mxu0 }
 0x967   : > { %v1317_v61 = vmax.f32 %v1312_v58, 0.0  ;;  %v1727_v62 = vpop.f32.mrb[3].mxu0 }
 0x969   : > { %v1319_v63 = vpack.c.bf16 %v1317_v61, %v1317_v61 }
 0x96b   : > { %1745 = vmatmul.mubr.bf16.vlgmr.msra.gmra.mrb[0].mxu1 %v1319_v63 }
 0xa3b   : > { %1429 = sbr.rel (%p1613_p7) target bundleno = 2638 (0xa4e), region = 121 }
 0xa3e   : > { %v1418_v1 = vpop.f32.mrb[0].mxu1 }
 0xa3f   : > { %v1424_v2 = vadd.f32 %v1418_v1, %v1318_v0  ;;  %v1746_v3 = vpop.f32.mrb[1].mxu1 }
 0xa40   : > { %v1421_v5 = vpop.f32.mrb[2].mxu1 }
 0xa41   : > { %1425 = vst.msk [vmem:[#allocation5] sm:$0xff] %vm1273_vm11, %v1424_v2  ;;  %v1747_v7 = vpop.f32.mrb[3].mxu1 }
 0xa48   : > { %v1431_v9 = vld [vmem:[#allocation5] sm:$0xff] }
 0xa49   : > { %v1432_v11 = vadd.f32 %v1431_v9, %v1430_v8 }
 0xa4b   : > { %v1440_v12 = vadd.f32 %v1614_v10, %v1432_v11 }
 0xa4d   : > { %1441 = vst.msk [vmem:[%s543_s17] sm:$0xff] %vm1273_vm11, %v1440_v12 }
 0xa4e PF: > { %s1616_s15 = sshll.u32 %s1986_s14, 7  ;;  %s2466_s21 = sld [smem:[#allocation25_spill]] }
 0xa4f   : > { %s1456_s22 = sshll.u32 %s543_s17, 4  ;;  %s2467_s19 = sand.u32 1, %s1966_s26   ;;  %s1457_s22 = int_to_ptr.vmem [resolvable:$true] %s1456_s22 }
 0xa50   : > { %s1443_s28 = scalar_lea.sflag [#allocation8], %s2467_s19  ;;  %s1888_s16 = scalar_lea.vmem %s1457_s22, 128 }
 0xa51   : > { %p1889_p8 = scmp.ne.s32.totalorder %s1457_s22, %s1888_s16  ;;  %s2019_s9 = smov [#allocation7]  }
 0xa52   : > { %s1892_s12 = sshll.u32 %s2019_s9, 4  ;;  %s1893_s12 = int_to_ptr.vmem [resolvable:$false] %s1892_s12 }
 0xa53   : > { %p1890_p9 = pnand %p1889_p8, %p2169_p10  ;;  %s1894_s27 = scalar_lea.vmem %s1893_s12, 256 }
 0xa54   : > { %s2360_s18 = scalar_lea.hbm %s2466_s21, %s1616_s15  ;;  %p1895_p13 = scmp.lt.s32.totalorder %s1457_s22, %s1893_s12 }
 0xa55   : > { %p1891_p11 = pneg %p1890_p9  ;;  %p1896_p0 = scmp.lt.s32.totalorder %s1894_s27, %s1888_s16 }
 0xa57   : > { %p1897_p1 = por %p1896_p0, %p1895_p13 }
 0xa59   : > { %p1898_p2 = pnand %p1897_p1, %p1891_p11 }
 0xa5b   : > { %1901 = shalt.err (!%p1898_p2)
}
 0xa5c   : > { %s1902_s14 = scalar_lea.hbm %s2360_s18, 128  ;;  %s1906_s25 = scalar_lea.hbm %s2466_s21, 256 }
 0xa5d   : > { %p1903_p3 = scmp.ne.s32.totalorder %s2360_s18, %s1902_s14  ;;  %p1907_p6 = scmp.lt.u32.totalorder %s2360_s18, %s2466_s21 }
 0xa5e   : > { %p1908_p7 = scmp.lt.u32.totalorder %s1906_s25, %s1902_s14  ;;  %p1910_p9 = scmp.lt.u32.totalorder %s1902_s14, %s2360_s18 }
 0xa5f   : > { %p1904_p4 = pnand %p1903_p3, %p2169_p10 }
 0xa60   : > { %p1909_p8 = por %p1908_p7, %p1907_p6 }
 0xa61   : > { %p1905_p5 = pneg %p1904_p4 }
 0xa62   : > { %p1911_p11 = por %p1910_p9, %p1909_p8 }
 0xa64   : > { %p1912_p13 = pnand %p1911_p11, %p1905_p5 }
 0xa66   : > { %1915 = shalt.err (!%p1912_p13)
}
 0xa67   : > { %1748 = dma.vmem_to_hbm [thread:$0]  (%p2169_p10), %s1457_s22, 128, %s2360_s18, %s1443_s28  }
 0xa68 PF: > { %s2468_s23 = sld [smem:[#allocation15_spill]]  ;;  %s2469_s13 = sld [smem:[#allocation10_spill]] }
 0xa6e   : > { %p1754_p0 = scmp.ge.s32.totalorder %s2468_s23, 2  ;;  %s1468_s30 = sand.u32 1, %s2469_s13  }
 0xa6f   : > { %s1469_s20 = scalar_lea.sflag [#allocation8], %s1468_s30 }
 0xa70   : > { %p1751_p1 = pnand %p1754_p0, %p2176_p12 }
 0xa72   : > { %1957 = dma.done.wait (!%p1751_p1), %s1469_s20, 128  }
 0xa73   : > { %1959 = vsyncadd (!%p1751_p1), %s1469_s20, 4294967168  ;;  %s26_s17 = sadd.s32 1, %s2468_s23   ;;  %s2471_s19 = sld [smem:[#allocation11_spill]] }
 0xa74   : > { %p23_p2 = scmp.ge.s32.totalorder %s26_s17, 6   ;;  %s2472_s27 = sld [smem:[#allocation19_spill]] }
 0xa75   : > { %s2473_s28 = sld [smem:[#allocation12_spill]]  ;;  %s2474_s29 = sld [smem:[#allocation18_spill]] }
 0xa76   : > { %s2475_s30 = sld [smem:[#allocation13_spill]]  ;;  %s2476_s14 = sld [smem:[#allocation14_spill]] }
 0xa77   : > { %s2477_s15 = sld [smem:[#allocation16_spill]]  ;;  %s2478_s16 = sld [smem:[#allocation17_spill]] }
 0xa78   : > { %s2479_s25 = smov %s1966_s26  ;;  %25 = sbr.rel (!%p23_p2) target bundleno = 12 (0xc), region = 170 }
 0xa79   : > { %s2480_s26 = smov %s2471_s19 }
 0xa7f   :  { %1474 = vsyncpa [#allocation8], 1 }
 0xa80   :  { %1476 = vsyncpa [#allocation8 + $0x1], 1 }

</bundles_post_ra>
